<compile_context>
chip_gen: v7x
topology: tpu7x:2x2x1
jax: 0.10.0
libtpu: 0.0.40
codegen_flags: <defaults>
</compile_context>

<pallas_src>
import functools

import jax
import jax.numpy as jnp
from jax.experimental import pallas as pl
from jax.experimental.pallas import tpu as pltpu

HIDDEN = 512  # fixed by the module: nn.Linear(input_dim, 512)


def mean_mil_hidden_kernel(x_ref, w1_ref, b1_ref, o_ref, *,
                           n_valid, tn, tb, inv_n, mask_needed):
    k = pl.program_id(2)

    @pl.when(k == 0)
    def _():
        o_ref[...] = jnp.zeros_like(o_ref)

    # First Linear on the MXU: flatten (TB bags x TN instances) into one M dim.
    # x arrives f32 (no host-side cast pass); cast to bf16 right before the dot.
    x = x_ref[...].reshape(tb * tn, -1).astype(jnp.bfloat16)            # (TB*TN, D)
    h = jnp.dot(x, w1_ref[...], preferred_element_type=jnp.float32)     # (TB*TN, TH) f32
    h = jnp.maximum(h + b1_ref[...], 0.0)                               # bias + ReLU (f32 VPU)

    if mask_needed:
        # Partial final N-block: rows >= n_valid hold unspecified data; zero
        # them with a select.  Within-bag instance index built without int div.
        inst = jax.lax.broadcasted_iota(jnp.int32, (tb, tn, 1), 1).reshape(tb * tn, 1)
        h = jnp.where(k * tn + inst < n_valid, h, 0.0)

    # Dropout(0.25) is identity in eval mode.
    # Per-bag instance sum on the MXU via a block-diagonal ones selector
    # (f32 matmul -> exact); keeps the VPU slot free when D is small.
    col = jax.lax.broadcasted_iota(jnp.int32, (tb, tb * tn), 1)
    row = jax.lax.broadcasted_iota(jnp.int32, (tb, tb * tn), 0)
    sel = ((col >= row * tn) & (col < (row + 1) * tn)).astype(jnp.float32)
    o_ref[...] += jnp.dot(sel, h, preferred_element_type=jnp.float32)   # (TB, TH)

    @pl.when(k == pl.num_programs(2) - 1)
    def _():
        o_ref[...] = o_ref[...] * inv_n      # single exact 1/N scale at finalize


def _choose_tile_b(batch):
    # Bags per grid step: full batch when small (block dim == full array dim),
    # otherwise a multiple-of-8 divisor so the (TB, H) output block stays
    # sublane-friendly.
    if batch <= 8:
        return batch
    if batch % 8 == 0:
        return 8
    return 1


def _choose_tile_n(n, d, tb, hidden):
    # Instance rows per grid step, sized from a conservative per-core VMEM
    # budget (fits v5e/v6e scoped defaults and v7x's 64 MiB, with room for the
    # resident W1 and the f32 hidden tile).
    budget = 20 * 1024 * 1024 - d * hidden * 2
    per_row = 2 * d * 4 + d * 2 + hidden * 4   # dbl-buffered f32 x + bf16 copy + f32 h
    rows = max(256, budget // (per_row * max(tb, 1)))
    if rows >= n:
        return n                                # whole bag per step
    return max(256, (rows // 256) * 256)        # multiple of 256 keeps the MXU M-dim dense


def _tensorcores_per_chip():
    # Heuristic: v7x-class parts expose 2 TensorCores per chip; v5e/v6e expose 1.
    try:
        kind = jax.devices()[0].device_kind.lower()
    except Exception:
        return 1
    return 2 if "7" in kind else 1


def mean_mil_forward(x, w1, b1, w2, b2, *,
                     tile_n=None, tile_b=None, split_hidden=None):
    """MeanMIL forward. x: [B,N,D]; w1: [D,512]; b1: [512]; w2: [512,C]; b2: [C]."""
    B, N, D = x.shape
    H = w1.shape[1]

    TB = tile_b if tile_b is not None else _choose_tile_b(B)
    assert B % TB == 0, (B, TB)
    TN = tile_n if tile_n is not None else _choose_tile_n(N, D, TB, H)
    num_k = pl.cdiv(N, TN)
    mask_needed = (N % TN) != 0

    # Split hidden columns across TensorCores (v7x) only when the batch axis
    # alone cannot occupy both cores; on single-core chips keep TH == H so x is
    # streamed from HBM exactly once.
    if split_hidden is None:
        split_hidden = (B // TB) < 2 and _tensorcores_per_chip() > 1
    TH = H // 2 if (split_hidden and H % 256 == 0) else H
    n_h = H // TH

    # One tiny host-side bf16 cast of W1 (done once); the big tensor x is NOT
    # cast on the host — it is cast inside the kernel.
    w1_bf = w1.astype(jnp.bfloat16)
    b1_2d = b1.reshape(1, H).astype(jnp.float32)

    kernel = functools.partial(
        mean_mil_hidden_kernel,
        n_valid=N, tn=TN, tb=TB, inv_n=1.0 / N, mask_needed=mask_needed)

    def vmem_estimate(weight_bufs):
        return (2 * TB * TN * D * 4                    # double-buffered f32 x tiles
                + TB * TN * D * 2                      # in-kernel bf16 copy of x
                + TB * TN * TH * 4                     # f32 hidden tile
                + weight_bufs * (D * TH * 2 + TH * 4)  # W1 + b1 buffers
                + 2 * TB * TH * 4                      # resident output block
                + (2 << 20))                           # headroom

    def build(single_buffer_weights):
        if single_buffer_weights:
            # W1/b1 are fetched once (constant index_map when n_h == 1):
            # single-buffer them to free a W1-sized VMEM buffer.
            w1_spec = pl.BlockSpec((D, TH), lambda bi, hi, ki: (0, hi),
                                   pipeline_mode=pl.Buffered(1))
            b1_spec = pl.BlockSpec((1, TH), lambda bi, hi, ki: (0, hi),
                                   pipeline_mode=pl.Buffered(1))
            weight_bufs = 1
        else:
            w1_spec = pl.BlockSpec((D, TH), lambda bi, hi, ki: (0, hi))
            b1_spec = pl.BlockSpec((1, TH), lambda bi, hi, ki: (0, hi))
            weight_bufs = 2
        vlim = int(min(max(vmem_estimate(weight_bufs), 32 * 1024 * 1024),
                       56 * 1024 * 1024))
        return pl.pallas_call(
            kernel,
            out_shape=jax.ShapeDtypeStruct((B, H), jnp.float32),
            grid_spec=pltpu.PrefetchScalarGridSpec(
                num_scalar_prefetch=0,
                grid=(B // TB, n_h, num_k),
                in_specs=[
                    pl.BlockSpec((TB, TN, D), lambda bi, hi, ki: (bi, ki, 0)),  # x (f32)
                    w1_spec,                                                    # W1 (bf16)
                    b1_spec,                                                    # b1 (f32)
                ],
                out_specs=pl.BlockSpec((TB, TH), lambda bi, hi, ki: (bi, hi)),
            ),
            compiler_params=pltpu.CompilerParams(
                dimension_semantics=("parallel", "parallel", "arbitrary"),
                vmem_limit_bytes=vlim),
        )

    want_single = hasattr(pl, "Buffered") and n_h == 1
    if want_single:
        try:
            hidden_mean = build(True)(x, w1_bf, b1_2d)
        except Exception:
            # Older Pallas without BlockSpec.pipeline_mode / Buffered(1) support.
            hidden_mean = build(False)(x, w1_bf, b1_2d)
    else:
        hidden_mean = build(False)(x, w1_bf, b1_2d)

    # Second Linear on the per-bag mean activations (exact hoist of the mean
    # above Linear(512, n_classes)); tiny, runs in plain XLA.
    return hidden_mean @ w2 + b2


def init_params(key, input_dim, hidden, n_classes):
    # Matches initialize_weights(): xavier_normal_ on Linear weights, zero biases.
    k1, k2 = jax.random.split(key)
    std1 = (2.0 / (input_dim + hidden)) ** 0.5
    std2 = (2.0 / (hidden + n_classes)) ** 0.5
    w1 = std1 * jax.random.normal(k1, (input_dim, hidden), dtype=jnp.float32)
    b1 = jnp.zeros((hidden,), dtype=jnp.float32)
    w2 = std2 * jax.random.normal(k2, (hidden, n_classes), dtype=jnp.float32)
    b2 = jnp.zeros((n_classes,), dtype=jnp.float32)
    return w1, b1, w2, b2


def reference_forward(x, w1, b1, w2, b2):
    # Mirrors the kernel's bf16 rounding of the matmul inputs; otherwise follows
    # the original op order (Linear -> ReLU -> [Dropout=id] -> Linear -> mean).
    xb = x.astype(jnp.bfloat16).astype(jnp.float32)
    wb = w1.astype(jnp.bfloat16).astype(jnp.float32)
    h = jnp.maximum(jnp.einsum('bnd,dh->bnh', xb, wb) + b1, 0.0)
    y = jnp.einsum('bnh,hc->bnc', h, w2) + b2
    return y.mean(axis=1)


def _check(x, params, **kw):
    out = jax.block_until_ready(mean_mil_forward(x, *params, **kw))
    ref = reference_forward(x, *params)
    assert out.shape == ref.shape, (out.shape, ref.shape)
    assert jnp.allclose(out, ref, atol=2e-3, rtol=2e-3), (out, ref)
    return out


if __name__ == "__main__":
    input_dim, hidden, n_classes = 64, HIDDEN, 1
    key = jax.random.PRNGKey(0)
    kx1, kx2, kp = jax.random.split(key, 3)
    params = init_params(kp, input_dim, hidden, n_classes)

    # Case 1: small bag, single reduction step (B=2, N=8, D=64).
    x1 = jax.random.normal(kx1, (2, 8, input_dim), dtype=jnp.float32)
    out = _check(x1, params)
    assert out.shape == (2, n_classes), out.shape

    # Case 2: ragged bag with forced small instance tiles -> exercises the
    # multi-step accumulator, the partial final block and the row mask.
    x2 = jax.random.normal(kx2, (2, 19, input_dim), dtype=jnp.float32)
    _check(x2, params, tile_n=8)

    # Case 3: same, with the hidden-column split (the v7x two-TensorCore path)
    # forced on so that grid axis is exercised on every generation.
    _check(x2, params, tile_n=8, split_hidden=True)

    # TODO(synk): Dropout(0.25) is identity here (eval mode); training-mode
    # dropout would need pltpu.prng_* and also breaks the mean-before-Linear2 hoist.
    # TODO(synk): act='gelu' and the optional `rrt` sub-module are not implemented
    # (module defaults act='relu', rrt=None).
    print("KERNEL_OK")
</pallas_src>

<mosaic_0001>
module attributes {stable_mosaic.version = 11 : i64} {
  func.func @mean_mil_hidden_kernel(%arg0: i32, %arg1: i32, %arg2: i32, %arg3: memref<2x8x64xf32, #tpu.memory_space<vmem>>, %arg4: memref<64x512xbf16, #tpu.memory_space<vmem>>, %arg5: memref<1x512xf32, #tpu.memory_space<vmem>>, %arg6: memref<2x512xf32, #tpu.memory_space<vmem>>) attributes {dimension_semantics = [#tpu.dimension_semantics<parallel>, #tpu.dimension_semantics<parallel>, #tpu.dimension_semantics<arbitrary>], iteration_bounds = array<i64: 1, 1, 1>, scalar_prefetch = 0 : i64, scratch_operands = 0 : i64, tpu.core_type = #tpu.core_type<tc>, window_params = [{transform_indices = @transform_0, window_bounds = array<i64: 2, 8, 64>}, {pipeline_mode = #tpu.pipeline_mode<synchronous>, transform_indices = @transform_1, window_bounds = array<i64: 64, 512>}, {pipeline_mode = #tpu.pipeline_mode<synchronous>, transform_indices = @transform_2, window_bounds = array<i64: 1, 512>}, {transform_indices = @transform_3, window_bounds = array<i64: 2, 512>}]} {
    %c0_i32 = arith.constant 0 : i32
    %0 = arith.cmpi eq, %arg2, %c0_i32 : i32
    %1 = arith.extui %0 : i1 to i32
    %c0_i32_0 = arith.constant 0 : i32
    %2 = arith.cmpi ne, %1, %c0_i32_0 : i32
    scf.if %2 {
      %cst_16 = arith.constant 0.000000e+00 : f32
      %33 = vector.broadcast %cst_16 : f32 to vector<2x512xf32>
      %c0_17 = arith.constant 0 : index
      %c0_18 = arith.constant 0 : index
      %34 = vector.load %arg6[%c0_17, %c0_18] : memref<2x512xf32, #tpu.memory_space<vmem>>, vector<2x512xf32>
      tpu.vector_store %arg6[%c0_17, %c0_18], %33 {strides = array<i32>} : memref<2x512xf32, #tpu.memory_space<vmem>>, vector<2x512xf32>,
    } else {
    }
    %c0 = arith.constant 0 : index
    %c0_1 = arith.constant 0 : index
    %c0_2 = arith.constant 0 : index
    %3 = vector.load %arg3[%c0, %c0_1, %c0_2] : memref<2x8x64xf32, #tpu.memory_space<vmem>>, vector<2x8x64xf32>
    %4 = vector.shape_cast %3 : vector<2x8x64xf32> to vector<16x64xf32>
    %5 = arith.truncf %4 : vector<16x64xf32> to vector<16x64xbf16>
    %c0_3 = arith.constant 0 : index
    %c0_4 = arith.constant 0 : index
    %6 = vector.load %arg4[%c0_3, %c0_4] : memref<64x512xbf16, #tpu.memory_space<vmem>>, vector<64x512xbf16>
    %cst = arith.constant dense<0.000000e+00> : vector<16x512xf32>
    %7 = tpu.matmul %5, %6, %cst {dimension_numbers = #tpu.dot_dimension_numbers<[1], [0], [0], [1], [0, 0, 1, 1], [], []>} : vector<16x64xbf16>, vector<64x512xbf16>, vector<16x512xf32> -> vector<16x512xf32>
    %c0_5 = arith.constant 0 : index
    %c0_6 = arith.constant 0 : index
    %8 = vector.load %arg5[%c0_5, %c0_6] : memref<1x512xf32, #tpu.memory_space<vmem>>, vector<1x512xf32>
    %9 = vector.broadcast %8 : vector<1x512xf32> to vector<16x512xf32>
    %10 = arith.addf %7, %9 : vector<16x512xf32>
    %cst_7 = arith.constant 0.000000e+00 : f32
    %11 = vector.broadcast %cst_7 : f32 to vector<16x512xf32>
    %12 = arith.maximumf %10, %11 : vector<16x512xf32>
    %13 = tpu.iota {dimensions = array<i32: 1>} : vector<2x16xi32>
    %14 = tpu.iota {dimensions = array<i32: 0>} : vector<2x16xi32>
    %c8_i32 = arith.constant 8 : i32
    %15 = vector.broadcast %c8_i32 : i32 to vector<2x16xi32>
    %16 = arith.muli %14, %15 : vector<2x16xi32>
    %17 = arith.cmpi sge, %13, %16 : vector<2x16xi32>
    %c1_i32 = arith.constant 1 : i32
    %18 = vector.broadcast %c1_i32 : i32 to vector<2x16xi32>
    %19 = arith.addi %14, %18 : vector<2x16xi32>
    %c8_i32_8 = arith.constant 8 : i32
    %20 = vector.broadcast %c8_i32_8 : i32 to vector<2x16xi32>
    %21 = arith.muli %19, %20 : vector<2x16xi32>
    %22 = arith.cmpi slt, %13, %21 : vector<2x16xi32>
    %23 = arith.andi %17, %22 : vector<2x16xi1>
    %24 = arith.extui %23 : vector<2x16xi1> to vector<2x16xi32>
    %25 = arith.sitofp %24 : vector<2x16xi32> to vector<2x16xf32>
    %c0_9 = arith.constant 0 : index
    %c0_10 = arith.constant 0 : index
    %26 = vector.load %arg6[%c0_9, %c0_10] : memref<2x512xf32, #tpu.memory_space<vmem>>, vector<2x512xf32>
    %cst_11 = arith.constant dense<0.000000e+00> : vector<2x512xf32>
    %27 = tpu.matmul %25, %12, %cst_11 {dimension_numbers = #tpu.dot_dimension_numbers<[1], [0], [0], [1], [0, 0, 1, 1], [], []>} : vector<2x16xf32>, vector<16x512xf32>, vector<2x512xf32> -> vector<2x512xf32>
    %28 = arith.addf %26, %27 : vector<2x512xf32>
    %c0_12 = arith.constant 0 : index
    %c0_13 = arith.constant 0 : index
    %29 = vector.load %arg6[%c0_12, %c0_13] : memref<2x512xf32, #tpu.memory_space<vmem>>, vector<2x512xf32>
    tpu.vector_store %arg6[%c0_12, %c0_13], %28 {strides = array<i32>} : memref<2x512xf32, #tpu.memory_space<vmem>>, vector<2x512xf32>,
    %c0_i32_14 = arith.constant 0 : i32
    %30 = arith.cmpi eq, %arg2, %c0_i32_14 : i32
    %31 = arith.extui %30 : i1 to i32
    %c0_i32_15 = arith.constant 0 : i32
    %32 = arith.cmpi ne, %31, %c0_i32_15 : i32
    scf.if %32 {
      %c0_16 = arith.constant 0 : index
      %c0_17 = arith.constant 0 : index
      %33 = vector.load %arg6[%c0_16, %c0_17] : memref<2x512xf32, #tpu.memory_space<vmem>>, vector<2x512xf32>
      %cst_18 = arith.constant 1.250000e-01 : f32
      %34 = vector.broadcast %cst_18 : f32 to vector<2x512xf32>
      %35 = arith.mulf %33, %34 : vector<2x512xf32>
      %c0_19 = arith.constant 0 : index
      %c0_20 = arith.constant 0 : index
      %36 = vector.load %arg6[%c0_19, %c0_20] : memref<2x512xf32, #tpu.memory_space<vmem>>, vector<2x512xf32>
      tpu.vector_store %arg6[%c0_19, %c0_20], %35 {strides = array<i32>} : memref<2x512xf32, #tpu.memory_space<vmem>>, vector<2x512xf32>,
    } else {
    }
    return
  }
  func.func @transform_0(%arg0: i32, %arg1: i32, %arg2: i32) -> (i32, i32, i32) {
    %c0_i32 = arith.constant 0 : i32
    %c0_i32_0 = arith.constant 0 : i32
    return %arg0, %arg2, %c0_i32 : i32, i32, i32
  }
  func.func @transform_1(%arg0: i32, %arg1: i32, %arg2: i32) -> (i32, i32) {
    %c0_i32 = arith.constant 0 : i32
    %c0_i32_0 = arith.constant 0 : i32
    return %c0_i32, %arg1 : i32, i32
  }
  func.func @transform_2(%arg0: i32, %arg1: i32, %arg2: i32) -> (i32, i32) {
    %c0_i32 = arith.constant 0 : i32
    %c0_i32_0 = arith.constant 0 : i32
    return %c0_i32, %arg1 : i32, i32
  }
  func.func @transform_3(%arg0: i32, %arg1: i32, %arg2: i32) -> (i32, i32) {
    %c0_i32 = arith.constant 0 : i32
    return %arg0, %arg1 : i32, i32
  }
}

module attributes {stable_mosaic.version = 11 : i64} {
  func.func @mean_mil_hidden_kernel(%arg0: i32, %arg1: i32, %arg2: i32, %arg3: memref<2x8x64xf32, #tpu.memory_space<vmem>>, %arg4: memref<64x512xbf16, #tpu.memory_space<vmem>>, %arg5: memref<1x512xf32, #tpu.memory_space<vmem>>, %arg6: memref<2x512xf32, #tpu.memory_space<vmem>>) attributes {dimension_semantics = [#tpu.dimension_semantics<parallel>, #tpu.dimension_semantics<parallel>, #tpu.dimension_semantics<arbitrary>], iteration_bounds = array<i64: 1, 1, 1>, scalar_prefetch = 0 : i64, scratch_operands = 0 : i64, tpu.core_type = #tpu.core_type<tc>, window_params = [{transform_indices = @transform_0, window_bounds = array<i64: 2, 8, 64>}, {transform_indices = @transform_1, window_bounds = array<i64: 64, 512>}, {transform_indices = @transform_2, window_bounds = array<i64: 1, 512>}, {transform_indices = @transform_3, window_bounds = array<i64: 2, 512>}]} {
    %c0_i32 = arith.constant 0 : i32
    %0 = arith.cmpi eq, %arg2, %c0_i32 : i32
    %1 = arith.extui %0 : i1 to i32
    %c0_i32_0 = arith.constant 0 : i32
    %2 = arith.cmpi ne, %1, %c0_i32_0 : i32
    scf.if %2 {
      %cst_16 = arith.constant 0.000000e+00 : f32
      %33 = vector.broadcast %cst_16 : f32 to vector<2x512xf32>
      %c0_17 = arith.constant 0 : index
      %c0_18 = arith.constant 0 : index
      %34 = vector.load %arg6[%c0_17, %c0_18] : memref<2x512xf32, #tpu.memory_space<vmem>>, vector<2x512xf32>
      tpu.vector_store %arg6[%c0_17, %c0_18], %33 {strides = array<i32>} : memref<2x512xf32, #tpu.memory_space<vmem>>, vector<2x512xf32>,
    } else {
    }
    %c0 = arith.constant 0 : index
    %c0_1 = arith.constant 0 : index
    %c0_2 = arith.constant 0 : index
    %3 = vector.load %arg3[%c0, %c0_1, %c0_2] : memref<2x8x64xf32, #tpu.memory_space<vmem>>, vector<2x8x64xf32>
    %4 = vector.shape_cast %3 : vector<2x8x64xf32> to vector<16x64xf32>
    %5 = arith.truncf %4 : vector<16x64xf32> to vector<16x64xbf16>
    %c0_3 = arith.constant 0 : index
    %c0_4 = arith.constant 0 : index
    %6 = vector.load %arg4[%c0_3, %c0_4] : memref<64x512xbf16, #tpu.memory_space<vmem>>, vector<64x512xbf16>
    %cst = arith.constant dense<0.000000e+00> : vector<16x512xf32>
    %7 = tpu.matmul %5, %6, %cst {dimension_numbers = #tpu.dot_dimension_numbers<[1], [0], [0], [1], [0, 0, 1, 1], [], []>} : vector<16x64xbf16>, vector<64x512xbf16>, vector<16x512xf32> -> vector<16x512xf32>
    %c0_5 = arith.constant 0 : index
    %c0_6 = arith.constant 0 : index
    %8 = vector.load %arg5[%c0_5, %c0_6] : memref<1x512xf32, #tpu.memory_space<vmem>>, vector<1x512xf32>
    %9 = vector.broadcast %8 : vector<1x512xf32> to vector<16x512xf32>
    %10 = arith.addf %7, %9 : vector<16x512xf32>
    %cst_7 = arith.constant 0.000000e+00 : f32
    %11 = vector.broadcast %cst_7 : f32 to vector<16x512xf32>
    %12 = arith.maximumf %10, %11 : vector<16x512xf32>
    %13 = tpu.iota {dimensions = array<i32: 1>} : vector<2x16xi32>
    %14 = tpu.iota {dimensions = array<i32: 0>} : vector<2x16xi32>
    %c8_i32 = arith.constant 8 : i32
    %15 = vector.broadcast %c8_i32 : i32 to vector<2x16xi32>
    %16 = arith.muli %14, %15 : vector<2x16xi32>
    %17 = arith.cmpi sge, %13, %16 : vector<2x16xi32>
    %c1_i32 = arith.constant 1 : i32
    %18 = vector.broadcast %c1_i32 : i32 to vector<2x16xi32>
    %19 = arith.addi %14, %18 : vector<2x16xi32>
    %c8_i32_8 = arith.constant 8 : i32
    %20 = vector.broadcast %c8_i32_8 : i32 to vector<2x16xi32>
    %21 = arith.muli %19, %20 : vector<2x16xi32>
    %22 = arith.cmpi slt, %13, %21 : vector<2x16xi32>
    %23 = arith.andi %17, %22 : vector<2x16xi1>
    %24 = arith.extui %23 : vector<2x16xi1> to vector<2x16xi32>
    %25 = arith.sitofp %24 : vector<2x16xi32> to vector<2x16xf32>
    %c0_9 = arith.constant 0 : index
    %c0_10 = arith.constant 0 : index
    %26 = vector.load %arg6[%c0_9, %c0_10] : memref<2x512xf32, #tpu.memory_space<vmem>>, vector<2x512xf32>
    %cst_11 = arith.constant dense<0.000000e+00> : vector<2x512xf32>
    %27 = tpu.matmul %25, %12, %cst_11 {dimension_numbers = #tpu.dot_dimension_numbers<[1], [0], [0], [1], [0, 0, 1, 1], [], []>} : vector<2x16xf32>, vector<16x512xf32>, vector<2x512xf32> -> vector<2x512xf32>
    %28 = arith.addf %26, %27 : vector<2x512xf32>
    %c0_12 = arith.constant 0 : index
    %c0_13 = arith.constant 0 : index
    %29 = vector.load %arg6[%c0_12, %c0_13] : memref<2x512xf32, #tpu.memory_space<vmem>>, vector<2x512xf32>
    tpu.vector_store %arg6[%c0_12, %c0_13], %28 {strides = array<i32>} : memref<2x512xf32, #tpu.memory_space<vmem>>, vector<2x512xf32>,
    %c0_i32_14 = arith.constant 0 : i32
    %30 = arith.cmpi eq, %arg2, %c0_i32_14 : i32
    %31 = arith.extui %30 : i1 to i32
    %c0_i32_15 = arith.constant 0 : i32
    %32 = arith.cmpi ne, %31, %c0_i32_15 : i32
    scf.if %32 {
      %c0_16 = arith.constant 0 : index
      %c0_17 = arith.constant 0 : index
      %33 = vector.load %arg6[%c0_16, %c0_17] : memref<2x512xf32, #tpu.memory_space<vmem>>, vector<2x512xf32>
      %cst_18 = arith.constant 1.250000e-01 : f32
      %34 = vector.broadcast %cst_18 : f32 to vector<2x512xf32>
      %35 = arith.mulf %33, %34 : vector<2x512xf32>
      %c0_19 = arith.constant 0 : index
      %c0_20 = arith.constant 0 : index
      %36 = vector.load %arg6[%c0_19, %c0_20] : memref<2x512xf32, #tpu.memory_space<vmem>>, vector<2x512xf32>
      tpu.vector_store %arg6[%c0_19, %c0_20], %35 {strides = array<i32>} : memref<2x512xf32, #tpu.memory_space<vmem>>, vector<2x512xf32>,
    } else {
    }
    return
  }
  func.func @transform_0(%arg0: i32, %arg1: i32, %arg2: i32) -> (i32, i32, i32) {
    %c0_i32 = arith.constant 0 : i32
    %c0_i32_0 = arith.constant 0 : i32
    return %arg0, %arg2, %c0_i32 : i32, i32, i32
  }
  func.func @transform_1(%arg0: i32, %arg1: i32, %arg2: i32) -> (i32, i32) {
    %c0_i32 = arith.constant 0 : i32
    %c0_i32_0 = arith.constant 0 : i32
    return %c0_i32, %arg1 : i32, i32
  }
  func.func @transform_2(%arg0: i32, %arg1: i32, %arg2: i32) -> (i32, i32) {
    %c0_i32 = arith.constant 0 : i32
    %c0_i32_0 = arith.constant 0 : i32
    return %c0_i32, %arg1 : i32, i32
  }
  func.func @transform_3(%arg0: i32, %arg1: i32, %arg2: i32) -> (i32, i32) {
    %c0_i32 = arith.constant 0 : i32
    return %arg0, %arg1 : i32, i32
  }
}

</mosaic_0001>

<bundles_post_ra>
// kernel: tpu_custom_call.1
= control target key start
LH: loop header
LB: loop body
LE: loop exit
PB: predicated region body
PF: predicated region fallthrough
CT: control target
= control target key end

     0   :  { %8 = vsyncpa [#allocation3], 0  ;;  %s689_s0 = inlined_call_operand.hbm [shape: f32[2,8,64], index: 0, kind: input, shape index: {}]   ;;  %s690_s1 = inlined_call_operand.hbm [shape: bf16[64,512], index: 1, kind: input, shape index: {}]   ;;  %s691_s2 = inlined_call_operand.vmem [shape: f32[1,512], index: 2, kind: input, shape index: {}]   ;;  %s692_s3 = inlined_call_operand.hbm [shape: f32[2,512], index: 3, kind: output, shape index: {}]  }
   0x1   :  { %9 = vsyncpa [#allocation6], 0 }
   0x2   :  { %10 = vsyncpa [#allocation4], 0  ;;  %s608_s12 = smov [#allocation2]   ;;  %s536_s16 = scalar_lea.hbm %s689_s0, 256 }
   0x3   :  { %s16_s13 = sshll.u32 %s608_s12, 4  ;;  %p537_p0 = scmp.ne.s32.totalorder %s689_s0, %s536_s16  ;;  %s17_s13 = int_to_ptr.vmem [resolvable:$true] %s16_s13 }
   0x4   :  { %p540_p1 = scmp.lt.u32.totalorder %s536_s16, %s689_s0 }
   0x6   :  { %p542_p2 = pnand %p540_p1, %p537_p0 }
   0x8   :  { %545 = shalt.err (!%p542_p2)
}
   0x9   :  { %s546_s21 = scalar_lea.vmem %s17_s13, 256  ;;  %p551_p4 = scmp.lt.s32.totalorder %s17_s13, %s17_s13 }
   0xa   :  { %p547_p3 = scmp.ne.s32.totalorder %s17_s13, %s546_s21  ;;  %p552_p5 = scmp.lt.s32.totalorder %s546_s21, %s546_s21 }
   0xc   :  { %p553_p6 = por %p552_p5, %p551_p4 }
   0xe   :  { %p554_p7 = pnand %p553_p6, %p547_p3 }
  0x10   :  { %557 = shalt.err (!%p554_p7)
}
  0x11   :  { %s609_s22 = smov 128   ;;  %s610_s23 = smov 8  }
  0x12   :  { %22 = dma.hbm_to_vmem [thread:$0]  %s689_s0, 256, %s17_s13, [#allocation3], %s609_s22, %s609_s22, %s610_s23  }
  0x13   :  { %s611_s26 = smov [#allocation5]   ;;  %s558_s30 = scalar_lea.hbm %s690_s1, 2048 }
  0x14   :  { %s28_s27 = sshll.u32 %s611_s26, 4  ;;  %p559_p8 = scmp.ne.s32.totalorder %s690_s1, %s558_s30  ;;  %s29_s27 = int_to_ptr.vmem [resolvable:$true] %s28_s27 }
  0x15   :  { %p562_p9 = scmp.lt.u32.totalorder %s558_s30, %s690_s1 }
  0x17   :  { %p564_p10 = pnand %p562_p9, %p559_p8 }
  0x19   :  { %567 = shalt.err (!%p564_p10)
}
  0x1a   :  { %s568_s8 = scalar_lea.vmem %s29_s27, 2048  ;;  %p573_p12 = scmp.lt.s32.totalorder %s29_s27, %s29_s27 }
  0x1b   :  { %p569_p11 = scmp.ne.s32.totalorder %s29_s27, %s568_s8  ;;  %p574_p13 = scmp.lt.s32.totalorder %s568_s8, %s568_s8 }
  0x1d   :  { %p575_p0 = por %p574_p13, %p573_p12 }
  0x1f   :  { %p576_p1 = pnand %p575_p0, %p569_p11 }
  0x21   :  { %579 = shalt.err (!%p576_p1)
}
  0x22   :  { %s612_s0 = smov 256   ;;  %s613_s9 = smov 16  }
  0x23   :  { %34 = dma.hbm_to_vmem [thread:$0]  %s690_s1, 2048, %s29_s27, [#allocation6], %s612_s0, %s612_s0, %s613_s9  }
  0x24   :  { %602 = dma.done.wait [#allocation3], 256  }
  0x25   :  { %603 = vsyncadd [#allocation3], 4294967040 }
  0x26   :  { %604 = dma.done.wait [#allocation6], 2048  }
  0x27   :  { %605 = vsyncadd [#allocation6], 4294965248  ;;  %v614_v0 = vmov 0   ;;  %v512_v1 = vld [vmem:[#allocation5 + $0x4] ss:$16 sps:$4 sm:$0xff]   ;;  %v50_v18 = vld [vmem:[#allocation2 + $0x8] sm:$0xff]  ;;  %v70_v21 = vlaneseq }
  0x28   :  { %206 = vmatprep.mubr.bf16.mxu0 %v614_v0  ;;  %249 = vmatprep.mubr.bf16.mxu1 %v614_v0  ;;  %v514_v2 = vld [vmem:[#allocation5 + $0xc] ss:$16 sps:$4 sm:$0xff]   ;;  %v516_v3 = vld [vmem:[#allocation5] ss:$16 sps:$4 sm:$0xff]   ;;  %v517_v4 = vld [vmem:[#allocation5 + $0x8] ss:$16 sps:$4 sm:$0xff]  }
  0x29   :  { %174 = vmatprep.subr.bf16.mxu0 %v512_v1  ;;  %217 = vmatprep.subr.bf16.mxu1 %v514_v2  ;;  %v518_v5 = vld [vmem:[#allocation5 + $0x24] ss:$16 sps:$4 sm:$0xff]   ;;  %v520_v6 = vld [vmem:[#allocation5 + $0x2c] ss:$16 sps:$4 sm:$0xff]   ;;  %v522_v7 = vld [vmem:[#allocation5 + $0x20] ss:$16 sps:$4 sm:$0xff]  }
  0x2a   :  { %175 = vmatpush1.bf16.msra.mxu0 %v516_v3  ;;  %218 = vmatpush1.bf16.msra.mxu1 %v517_v4  ;;  %v523_v8 = vld [vmem:[#allocation5 + $0x28] ss:$16 sps:$4 sm:$0xff]   ;;  %v524_v9 = vld [vmem:[#allocation5 + $0x44] ss:$16 sps:$4 sm:$0xff]   ;;  %v526_v10 = vld [vmem:[#allocation5 + $0x4c] ss:$16 sps:$4 sm:$0xff]  }
  0x2b   :  { %176 = vmatprep.subr.bf16.mxu0 %v518_v5  ;;  %219 = vmatprep.subr.bf16.mxu1 %v520_v6  ;;  %v528_v11 = vld [vmem:[#allocation5 + $0x40] ss:$16 sps:$4 sm:$0xff]   ;;  %v529_v12 = vld [vmem:[#allocation5 + $0x48] ss:$16 sps:$4 sm:$0xff]   ;;  %v530_v13 = vld [vmem:[#allocation5 + $0x64] ss:$16 sps:$4 sm:$0xff]  }
  0x2c   :  { %v532_v14 = vld [vmem:[#allocation5 + $0x6c] ss:$16 sps:$4 sm:$0xff]   ;;  %v534_v15 = vld [vmem:[#allocation5 + $0x60] ss:$16 sps:$4 sm:$0xff]   ;;  %v535_v16 = vld [vmem:[#allocation5 + $0x68] ss:$16 sps:$4 sm:$0xff]  }
  0x2d   :  { %v49_v17 = vld [vmem:[#allocation2] sm:$0xff]  ;;  %vm170_vm0 = vcmask 523264   ;;  %v615_v20 = vmov 0.0   ;;  %v71_v22 = vshrl.u32 %v70_v21, 7  ;;  %v269_v35 = vand.u32 127, %v70_v21 }
  0x2e   :  { %177 = vmatpush1.bf16.msra.mxu0 %v522_v7  ;;  %220 = vmatpush1.bf16.msra.mxu1 %v523_v8  ;;  %v51_v19 = vpack.c.bf16 %v50_v18, %v49_v17  ;;  %v68_v25 = vld [vmem:[%s691_s2] sm:$0xf]  ;;  %vm281_vm4 = vcmask 130048   ;;  %v616_v3 = vmov 1983009808   ;;  %s617_s2 = smov [#allocation7]  }
  0x2f   :  { %178 = vmatprep.subr.bf16.mxu0 %v524_v9  ;;  %221 = vmatprep.subr.bf16.mxu1 %v526_v10  ;;  %v72_v23 = vsub.s32 0, %v71_v22  ;;  %v80_v24 = vsub.s32 2, %v71_v22  ;;  %v76_v26 = vsub.s32 1, %v71_v22  ;;  %v84_v27 = vsub.s32 3, %v71_v22  ;;  %s463_s13 = sshll.u32 %s617_s2, 4  ;;  %s464_s13 = int_to_ptr.vmem [resolvable:$true] %s463_s13 }
  0x30   :  { %v274_v28 = vadd.s32 1, %v71_v22  ;;  %v272_v36 = vmul.u32 8, %v71_v22  ;;  %v434_v4 = vunpack.c.l.s4 %v616_v3  ;;  %s580_s14 = scalar_lea.vmem %s464_s13, 128  ;;  %p585_p3 = scmp.lt.s32.totalorder %s464_s13, %s464_s13 }
  0x31   :  { %v73_v29 = vrot.slane %v68_v25, %v72_v23  ;;  %v81_v30 = vrot.slane %v68_v25, %v80_v24  ;;  %v77_v31 = vrot.slane %v68_v25, %v76_v26  ;;  %v85_v32 = vrot.slane %v68_v25, %v84_v27  ;;  %p581_p2 = scmp.ne.s32.totalorder %s464_s13, %s580_s14  ;;  %p586_p4 = scmp.lt.s32.totalorder %s580_s14, %s580_s14 }
  0x32   :  { %179 = vmatpush1.bf16.msra.mxu0 %v528_v11  ;;  %222 = vmatpush1.bf16.msra.mxu1 %v529_v12  ;;  %v275_v37 = vmul.u32 8, %v274_v28  ;;  %vm665_vm1 = vcmp.ge.s32.totalorder %v269_v35, %v272_v36  ;;  %v435_v5 = vunpack.c.0.s8 %v434_v4 }
  0x33   :  { %180 = vmatprep.subr.bf16.mxu0 %v530_v13  ;;  %223 = vmatprep.subr.bf16.mxu1 %v532_v14  ;;  %p587_p5 = por %p586_p4, %p585_p3 }
  0x34   :  { %vm669_vm2 = vcmp.lt.s32.totalorder %v269_v35, %v275_v37  ;;  %v438_v8 = vsub.s32 %v435_v5, %v71_v22 }
  0x35   :  { %vm277_vm3 = vmand %vm665_vm1, %vm669_vm2  ;;  %p588_p6 = pnand %p587_p5, %p581_p2 }
  0x36   :  { %181 = vmatpush1.bf16.msra.mxu0 %v534_v15  ;;  %224 = vmatpush1.bf16.msra.mxu1 %v535_v16  ;;  %v491_v2 = vsel %vm277_vm3, 1.0, %v615_v20 }
  0x39   :  { %489 = vmatmul.mubr.msk.bf16.vlgmr.msra.gmra.mrb[0].mxu0 %vm170_vm0, %v51_v19  ;;  %490 = vmatmul.mubr.msk.bf16.vlgmr.msra.gmra.mrb[0].mxu1 %vm170_vm0, %v51_v19 }
  0x3a   :  { %349 = vmatprep.mubr.f32.mxu0 %v615_v20  ;;  %420 = vmatprep.mubr.f32.mxu1 %v615_v20 }
 0x10c   :  { %v208_v33 = vpop.f32.mrb[0].mxu0  ;;  %v251_v34 = vpop.f32.mrb[0].mxu1 }
 0x10d   :  { %v209_v38 = vadd.f32 %v208_v33, %v73_v29  ;;  %v252_v39 = vadd.f32 %v251_v34, %v81_v30  ;;  %v210_v40 = vpop.f32.mrb[1].mxu0  ;;  %v253_v41 = vpop.f32.mrb[1].mxu1 }
 0x10e   :  { %v211_v42 = vadd.f32 %v210_v40, %v77_v31  ;;  %v254_v43 = vadd.f32 %v253_v41, %v85_v32  ;;  %v212_v44 = vpop.f32.mrb[2].mxu0  ;;  %v255_v45 = vpop.f32.mrb[2].mxu1 }
 0x10f   :  { %v213_v46 = vadd.f32 %v212_v44, %v73_v29  ;;  %v256_v47 = vadd.f32 %v255_v45, %v81_v30  ;;  %v214_v48 = vpop.f32.mrb[3].mxu0  ;;  %v257_v49 = vpop.f32.mrb[3].mxu1  ;;  %v260_v54 = vmax.f32 %v209_v38, 0.0  ;;  %v262_v55 = vmax.f32 %v252_v39, 0.0 }
 0x110   :  { %v215_v50 = vadd.f32 %v214_v48, %v77_v31  ;;  %v258_v51 = vadd.f32 %v257_v49, %v85_v32  ;;  %v261_v58 = vmax.f32 %v211_v42, 0.0  ;;  %v263_v59 = vmax.f32 %v254_v43, 0.0 }
 0x111   :  { %v264_v56 = vmax.f32 %v213_v46, 0.0  ;;  %v266_v57 = vmax.f32 %v256_v47, 0.0 }
 0x112   :  { %v265_v60 = vmax.f32 %v215_v50, 0.0  ;;  %v267_v61 = vmax.f32 %v258_v51, 0.0 }
 0x113   :  { %v496_v62 = vpack.c.bf16 %v264_v56, %v260_v54  ;;  %v500_v63 = vpack.c.bf16 %v266_v57, %v262_v55 }
 0x114   :  { %v494_v0 = vpack.c.bf16 %v265_v60, %v261_v58  ;;  %v498_v1 = vpack.c.bf16 %v267_v61, %v263_v59 }
 0x116   :  { %495 = vmatprep.subr.bf16.mxu0 %v494_v0  ;;  %499 = vmatprep.subr.bf16.mxu1 %v498_v1 }
 0x117   :  { %497 = vmatpush1.bf16.msra.mxu0 %v496_v62  ;;  %501 = vmatpush1.bf16.msra.mxu1 %v500_v63 }
 0x11a   :  { %492 = vmatmul.mubr.msk.f32.vlgmr.msra.gmra.mrb[4].mxu0 %vm281_vm4, %v491_v2  ;;  %493 = vmatmul.mubr.msk.f32.vlgmr.msra.gmra.mrb[4].mxu1 %vm281_vm4, %v491_v2 }
 0x1ed   :  { %v351_v6 = vpop.f32.mrb[4].mxu0  ;;  %v422_v7 = vpop.f32.mrb[4].mxu1 }
 0x1ee   :  { %v353_v9 = vpop.f32.mrb[5].mxu0  ;;  %v424_v10 = vpop.f32.mrb[5].mxu1 }
 0x1ef   :  { %v431_v11 = vcombine.low %v351_v6, %v353_v9  ;;  %v432_v12 = vcombine.low %v422_v7, %v424_v10 }
 0x1f1   :  { %v439_v13 = vrot.slane %v431_v11, %v438_v8  ;;  %v446_v14 = vrot.slane %v432_v12, %v438_v8 }
 0x1f3   :  { %v447_v15 = vcombine.low %v439_v13, %v446_v14 }
 0x1f5   :  { %v455_v16 = vmul.f32 0.125, %v447_v15 }
 0x1f7   :  { %456 = vst [vmem:[#allocation7] sm:$0xff] %v455_v16 }
 0x1f8   :  { %591 = shalt.err (!%p588_p6)
}
 0x1f9   :  { %s592_s17 = scalar_lea.hbm %s692_s3, 128 }
 0x1fa   :  { %p593_p7 = scmp.ne.s32.totalorder %s692_s3, %s592_s17  ;;  %p596_p8 = scmp.lt.u32.totalorder %s592_s17, %s692_s3 }
 0x1fc   :  { %p598_p9 = pnand %p596_p8, %p593_p7 }
 0x1fe   :  { %601 = shalt.err (!%p598_p9)
}
 0x1ff   :  { %466 = dma.vmem_to_hbm [thread:$0]  %s464_s13, 128, %s692_s3, [#allocation4]  }
 0x200   :  { %606 = dma.done.wait [#allocation4], 128  }
 0x201   :  { %607 = vsyncadd [#allocation4], 4294967168 }
 0x202   :  { %470 = vsyncpa [#allocation3], 1 }
 0x203   :  { %471 = vsyncpa [#allocation6], 1 }
 0x204   :  { %472 = vsyncpa [#allocation4], 1 }

// kernel: tpu_custom_call.1
= control target key start
LH: loop header
LB: loop body
LE: loop exit
PB: predicated region body
PF: predicated region fallthrough
CT: control target
= control target key end

     0   :  { %8 = vsyncpa [#allocation3], 0  ;;  %s689_s0 = inlined_call_operand.hbm [shape: f32[2,8,64], index: 0, kind: input, shape index: {}]   ;;  %s690_s1 = inlined_call_operand.hbm [shape: bf16[64,512], index: 1, kind: input, shape index: {}]   ;;  %s691_s2 = inlined_call_operand.vmem [shape: f32[1,512], index: 2, kind: input, shape index: {}]   ;;  %s692_s3 = inlined_call_operand.hbm [shape: f32[2,512], index: 3, kind: output, shape index: {}]  }
   0x1   :  { %9 = vsyncpa [#allocation6], 0 }
   0x2   :  { %10 = vsyncpa [#allocation4], 0  ;;  %s608_s12 = smov [#allocation2]   ;;  %s536_s16 = scalar_lea.hbm %s689_s0, 256 }
   0x3   :  { %s16_s13 = sshll.u32 %s608_s12, 4  ;;  %p537_p0 = scmp.ne.s32.totalorder %s689_s0, %s536_s16  ;;  %s17_s13 = int_to_ptr.vmem [resolvable:$true] %s16_s13 }
   0x4   :  { %p540_p1 = scmp.lt.u32.totalorder %s536_s16, %s689_s0 }
   0x6   :  { %p542_p2 = pnand %p540_p1, %p537_p0 }
   0x8   :  { %545 = shalt.err (!%p542_p2)
}
   0x9   :  { %s546_s21 = scalar_lea.vmem %s17_s13, 256  ;;  %p551_p4 = scmp.lt.s32.totalorder %s17_s13, %s17_s13 }
   0xa   :  { %p547_p3 = scmp.ne.s32.totalorder %s17_s13, %s546_s21  ;;  %p552_p5 = scmp.lt.s32.totalorder %s546_s21, %s546_s21 }
   0xc   :  { %p553_p6 = por %p552_p5, %p551_p4 }
   0xe   :  { %p554_p7 = pnand %p553_p6, %p547_p3 }
  0x10   :  { %557 = shalt.err (!%p554_p7)
}
  0x11   :  { %s609_s22 = smov 128   ;;  %s610_s23 = smov 8  }
  0x12   :  { %22 = dma.hbm_to_vmem [thread:$0]  %s689_s0, 256, %s17_s13, [#allocation3], %s609_s22, %s609_s22, %s610_s23  }
  0x13   :  { %s611_s26 = smov [#allocation5]   ;;  %s558_s30 = scalar_lea.hbm %s690_s1, 2048 }
  0x14   :  { %s28_s27 = sshll.u32 %s611_s26, 4  ;;  %p559_p8 = scmp.ne.s32.totalorder %s690_s1, %s558_s30  ;;  %s29_s27 = int_to_ptr.vmem [resolvable:$true] %s28_s27 }
  0x15   :  { %p562_p9 = scmp.lt.u32.totalorder %s558_s30, %s690_s1 }
  0x17   :  { %p564_p10 = pnand %p562_p9, %p559_p8 }
  0x19   :  { %567 = shalt.err (!%p564_p10)
}
  0x1a   :  { %s568_s8 = scalar_lea.vmem %s29_s27, 2048  ;;  %p573_p12 = scmp.lt.s32.totalorder %s29_s27, %s29_s27 }
  0x1b   :  { %p569_p11 = scmp.ne.s32.totalorder %s29_s27, %s568_s8  ;;  %p574_p13 = scmp.lt.s32.totalorder %s568_s8, %s568_s8 }
  0x1d   :  { %p575_p0 = por %p574_p13, %p573_p12 }
  0x1f   :  { %p576_p1 = pnand %p575_p0, %p569_p11 }
  0x21   :  { %579 = shalt.err (!%p576_p1)
}
  0x22   :  { %s612_s0 = smov 256   ;;  %s613_s9 = smov 16  }
  0x23   :  { %34 = dma.hbm_to_vmem [thread:$0]  %s690_s1, 2048, %s29_s27, [#allocation6], %s612_s0, %s612_s0, %s613_s9  }
  0x24   :  { %602 = dma.done.wait [#allocation3], 256  }
  0x25   :  { %603 = vsyncadd [#allocation3], 4294967040 }
  0x26   :  { %604 = dma.done.wait [#allocation6], 2048  }
  0x27   :  { %605 = vsyncadd [#allocation6], 4294965248  ;;  %v614_v0 = vmov 0   ;;  %v512_v1 = vld [vmem:[#allocation5 + $0x4] ss:$16 sps:$4 sm:$0xff]   ;;  %v50_v18 = vld [vmem:[#allocation2 + $0x8] sm:$0xff]  ;;  %v70_v21 = vlaneseq }
  0x28   :  { %206 = vmatprep.mubr.bf16.mxu0 %v614_v0  ;;  %249 = vmatprep.mubr.bf16.mxu1 %v614_v0  ;;  %v514_v2 = vld [vmem:[#allocation5 + $0xc] ss:$16 sps:$4 sm:$0xff]   ;;  %v516_v3 = vld [vmem:[#allocation5] ss:$16 sps:$4 sm:$0xff]   ;;  %v517_v4 = vld [vmem:[#allocation5 + $0x8] ss:$16 sps:$4 sm:$0xff]  }
  0x29   :  { %174 = vmatprep.subr.bf16.mxu0 %v512_v1  ;;  %217 = vmatprep.subr.bf16.mxu1 %v514_v2  ;;  %v518_v5 = vld [vmem:[#allocation5 + $0x24] ss:$16 sps:$4 sm:$0xff]   ;;  %v520_v6 = vld [vmem:[#allocation5 + $0x2c] ss:$16 sps:$4 sm:$0xff]   ;;  %v522_v7 = vld [vmem:[#allocation5 + $0x20] ss:$16 sps:$4 sm:$0xff]  }
  0x2a   :  { %175 = vmatpush1.bf16.msra.mxu0 %v516_v3  ;;  %218 = vmatpush1.bf16.msra.mxu1 %v517_v4  ;;  %v523_v8 = vld [vmem:[#allocation5 + $0x28] ss:$16 sps:$4 sm:$0xff]   ;;  %v524_v9 = vld [vmem:[#allocation5 + $0x44] ss:$16 sps:$4 sm:$0xff]   ;;  %v526_v10 = vld [vmem:[#allocation5 + $0x4c] ss:$16 sps:$4 sm:$0xff]  }
  0x2b   :  { %176 = vmatprep.subr.bf16.mxu0 %v518_v5  ;;  %219 = vmatprep.subr.bf16.mxu1 %v520_v6  ;;  %v528_v11 = vld [vmem:[#allocation5 + $0x40] ss:$16 sps:$4 sm:$0xff]   ;;  %v529_v12 = vld [vmem:[#allocation5 + $0x48] ss:$16 sps:$4 sm:$0xff]   ;;  %v530_v13 = vld [vmem:[#allocation5 + $0x64] ss:$16 sps:$4 sm:$0xff]  }
  0x2c   :  { %v532_v14 = vld [vmem:[#allocation5 + $0x6c] ss:$16 sps:$4 sm:$0xff]   ;;  %v534_v15 = vld [vmem:[#allocation5 + $0x60] ss:$16 sps:$4 sm:$0xff]   ;;  %v535_v16 = vld [vmem:[#allocation5 + $0x68] ss:$16 sps:$4 sm:$0xff]  }
  0x2d   :  { %v49_v17 = vld [vmem:[#allocation2] sm:$0xff]  ;;  %vm170_vm0 = vcmask 523264   ;;  %v615_v20 = vmov 0.0   ;;  %v71_v22 = vshrl.u32 %v70_v21, 7  ;;  %v269_v35 = vand.u32 127, %v70_v21 }
  0x2e   :  { %177 = vmatpush1.bf16.msra.mxu0 %v522_v7  ;;  %220 = vmatpush1.bf16.msra.mxu1 %v523_v8  ;;  %v51_v19 = vpack.c.bf16 %v50_v18, %v49_v17  ;;  %v68_v25 = vld [vmem:[%s691_s2] sm:$0xf]  ;;  %vm281_vm4 = vcmask 130048   ;;  %v616_v3 = vmov 1983009808   ;;  %s617_s2 = smov [#allocation7]  }
  0x2f   :  { %178 = vmatprep.subr.bf16.mxu0 %v524_v9  ;;  %221 = vmatprep.subr.bf16.mxu1 %v526_v10  ;;  %v72_v23 = vsub.s32 0, %v71_v22  ;;  %v80_v24 = vsub.s32 2, %v71_v22  ;;  %v76_v26 = vsub.s32 1, %v71_v22  ;;  %v84_v27 = vsub.s32 3, %v71_v22  ;;  %s463_s13 = sshll.u32 %s617_s2, 4  ;;  %s464_s13 = int_to_ptr.vmem [resolvable:$true] %s463_s13 }
  0x30   :  { %v274_v28 = vadd.s32 1, %v71_v22  ;;  %v272_v36 = vmul.u32 8, %v71_v22  ;;  %v434_v4 = vunpack.c.l.s4 %v616_v3  ;;  %s580_s14 = scalar_lea.vmem %s464_s13, 128  ;;  %p585_p3 = scmp.lt.s32.totalorder %s464_s13, %s464_s13 }
  0x31   :  { %v73_v29 = vrot.slane %v68_v25, %v72_v23  ;;  %v81_v30 = vrot.slane %v68_v25, %v80_v24  ;;  %v77_v31 = vrot.slane %v68_v25, %v76_v26  ;;  %v85_v32 = vrot.slane %v68_v25, %v84_v27  ;;  %p581_p2 = scmp.ne.s32.totalorder %s464_s13, %s580_s14  ;;  %p586_p4 = scmp.lt.s32.totalorder %s580_s14, %s580_s14 }
  0x32   :  { %179 = vmatpush1.bf16.msra.mxu0 %v528_v11  ;;  %222 = vmatpush1.bf16.msra.mxu1 %v529_v12  ;;  %v275_v37 = vmul.u32 8, %v274_v28  ;;  %vm665_vm1 = vcmp.ge.s32.totalorder %v269_v35, %v272_v36  ;;  %v435_v5 = vunpack.c.0.s8 %v434_v4 }
  0x33   :  { %180 = vmatprep.subr.bf16.mxu0 %v530_v13  ;;  %223 = vmatprep.subr.bf16.mxu1 %v532_v14  ;;  %p587_p5 = por %p586_p4, %p585_p3 }
  0x34   :  { %vm669_vm2 = vcmp.lt.s32.totalorder %v269_v35, %v275_v37  ;;  %v438_v8 = vsub.s32 %v435_v5, %v71_v22 }
  0x35   :  { %vm277_vm3 = vmand %vm665_vm1, %vm669_vm2  ;;  %p588_p6 = pnand %p587_p5, %p581_p2 }
  0x36   :  { %181 = vmatpush1.bf16.msra.mxu0 %v534_v15  ;;  %224 = vmatpush1.bf16.msra.mxu1 %v535_v16  ;;  %v491_v2 = vsel %vm277_vm3, 1.0, %v615_v20 }
  0x39   :  { %489 = vmatmul.mubr.msk.bf16.vlgmr.msra.gmra.mrb[0].mxu0 %vm170_vm0, %v51_v19  ;;  %490 = vmatmul.mubr.msk.bf16.vlgmr.msra.gmra.mrb[0].mxu1 %vm170_vm0, %v51_v19 }
  0x3a   :  { %349 = vmatprep.mubr.f32.mxu0 %v615_v20  ;;  %420 = vmatprep.mubr.f32.mxu1 %v615_v20 }
 0x10c   :  { %v208_v33 = vpop.f32.mrb[0].mxu0  ;;  %v251_v34 = vpop.f32.mrb[0].mxu1 }
 0x10d   :  { %v209_v38 = vadd.f32 %v208_v33, %v73_v29  ;;  %v252_v39 = vadd.f32 %v251_v34, %v81_v30  ;;  %v210_v40 = vpop.f32.mrb[1].mxu0  ;;  %v253_v41 = vpop.f32.mrb[1].mxu1 }
 0x10e   :  { %v211_v42 = vadd.f32 %v210_v40, %v77_v31  ;;  %v254_v43 = vadd.f32 %v253_v41, %v85_v32  ;;  %v212_v44 = vpop.f32.mrb[2].mxu0  ;;  %v255_v45 = vpop.f32.mrb[2].mxu1 }
 0x10f   :  { %v213_v46 = vadd.f32 %v212_v44, %v73_v29  ;;  %v256_v47 = vadd.f32 %v255_v45, %v81_v30  ;;  %v214_v48 = vpop.f32.mrb[3].mxu0  ;;  %v257_v49 = vpop.f32.mrb[3].mxu1  ;;  %v260_v54 = vmax.f32 %v209_v38, 0.0  ;;  %v262_v55 = vmax.f32 %v252_v39, 0.0 }
 0x110   :  { %v215_v50 = vadd.f32 %v214_v48, %v77_v31  ;;  %v258_v51 = vadd.f32 %v257_v49, %v85_v32  ;;  %v261_v58 = vmax.f32 %v211_v42, 0.0  ;;  %v263_v59 = vmax.f32 %v254_v43, 0.0 }
 0x111   :  { %v264_v56 = vmax.f32 %v213_v46, 0.0  ;;  %v266_v57 = vmax.f32 %v256_v47, 0.0 }
 0x112   :  { %v265_v60 = vmax.f32 %v215_v50, 0.0  ;;  %v267_v61 = vmax.f32 %v258_v51, 0.0 }
 0x113   :  { %v496_v62 = vpack.c.bf16 %v264_v56, %v260_v54  ;;  %v500_v63 = vpack.c.bf16 %v266_v57, %v262_v55 }
 0x114   :  { %v494_v0 = vpack.c.bf16 %v265_v60, %v261_v58  ;;  %v498_v1 = vpack.c.bf16 %v267_v61, %v263_v59 }
 0x116   :  { %495 = vmatprep.subr.bf16.mxu0 %v494_v0  ;;  %499 = vmatprep.subr.bf16.mxu1 %v498_v1 }
 0x117   :  { %497 = vmatpush1.bf16.msra.mxu0 %v496_v62  ;;  %501 = vmatpush1.bf16.msra.mxu1 %v500_v63 }
 0x11a   :  { %492 = vmatmul.mubr.msk.f32.vlgmr.msra.gmra.mrb[4].mxu0 %vm281_vm4, %v491_v2  ;;  %493 = vmatmul.mubr.msk.f32.vlgmr.msra.gmra.mrb[4].mxu1 %vm281_vm4, %v491_v2 }
 0x1ed   :  { %v351_v6 = vpop.f32.mrb[4].mxu0  ;;  %v422_v7 = vpop.f32.mrb[4].mxu1 }
 0x1ee   :  { %v353_v9 = vpop.f32.mrb[5].mxu0  ;;  %v424_v10 = vpop.f32.mrb[5].mxu1 }
 0x1ef   :  { %v431_v11 = vcombine.low %v351_v6, %v353_v9  ;;  %v432_v12 = vcombine.low %v422_v7, %v424_v10 }
 0x1f1   :  { %v439_v13 = vrot.slane %v431_v11, %v438_v8  ;;  %v446_v14 = vrot.slane %v432_v12, %v438_v8 }
 0x1f3   :  { %v447_v15 = vcombine.low %v439_v13, %v446_v14 }
 0x1f5   :  { %v455_v16 = vmul.f32 0.125, %v447_v15 }
 0x1f7   :  { %456 = vst [vmem:[#allocation7] sm:$0xff] %v455_v16 }
 0x1f8   :  { %591 = shalt.err (!%p588_p6)
}
 0x1f9   :  { %s592_s17 = scalar_lea.hbm %s692_s3, 128 }
 0x1fa   :  { %p593_p7 = scmp.ne.s32.totalorder %s692_s3, %s592_s17  ;;  %p596_p8 = scmp.lt.u32.totalorder %s592_s17, %s692_s3 }
 0x1fc   :  { %p598_p9 = pnand %p596_p8, %p593_p7 }
 0x1fe   :  { %601 = shalt.err (!%p598_p9)
}
 0x1ff   :  { %466 = dma.vmem_to_hbm [thread:$0]  %s464_s13, 128, %s692_s3, [#allocation4]  }
 0x200   :  { %606 = dma.done.wait [#allocation4], 128  }
 0x201   :  { %607 = vsyncadd [#allocation4], 4294967168 }
 0x202   :  { %470 = vsyncpa [#allocation3], 1 }
 0x203   :  { %471 = vsyncpa [#allocation6], 1 }
 0x204   :  { %472 = vsyncpa [#allocation4], 1 }

</bundles_post_ra>
